<compile_context>
chip_gen: v7x
topology: tpu7x:2x2x1
jax: 0.10.0
libtpu: 0.0.40
codegen_flags: <defaults>
</compile_context>

<pallas_src>
import jax
import jax.numpy as jnp
from jax.experimental import pallas as pl
from jax.experimental.pallas import tpu as pltpu

HIDDEN_DIM = 16  # args['hidden_dim']


def _firstnet_kernel(x_ref, w_ref, b_ref, o_ref):
    # x_ref: (TB, F)  w_ref: (F, H)  b_ref: (1, H)  o_ref: (TB, H)
    z = jnp.dot(x_ref[...], w_ref[...], preferred_element_type=jnp.float32)
    z = z + b_ref[...]                              # bias broadcast over the batch tile
    o_ref[...] = jnp.maximum(z, 0.0).astype(o_ref.dtype)   # ReLU


def firstnet_forward(x, weight, bias, *, block_b=1024):
    """FirstNet forward: relu(x @ weight.T + bias).

    x:      (B, F) float
    weight: (H, F) torch nn.Linear layout (out_features, in_features)
    bias:   (H,)
    """
    B, F = x.shape
    H = weight.shape[0]

    x = x.astype(jnp.float32)
    w_t = weight.T.astype(jnp.float32)            # (F, H) - tiny one-time transpose
    b = bias.reshape(1, H).astype(jnp.float32)    # (1, H)

    # Batch tile: full B when small, else block_b rounded up to a sublane multiple (8).
    tb = int(min(block_b, B))
    if tb != B:
        tb = ((tb + 7) // 8) * 8
    n_tiles = pl.cdiv(B, tb)
    b_pad = n_tiles * tb
    if b_pad != B:
        x = jnp.pad(x, ((0, b_pad - B), (0, 0)))  # pad so every tile is full / in-bounds

    out = pl.pallas_call(
        _firstnet_kernel,
        out_shape=jax.ShapeDtypeStruct((b_pad, H), jnp.float32),
        grid_spec=pltpu.PrefetchScalarGridSpec(
            num_scalar_prefetch=0,
            grid=(n_tiles,),
            in_specs=[
                pl.BlockSpec((tb, F), lambda i: (i, 0)),   # streamed batch tiles of x
                pl.BlockSpec((F, H), lambda i: (0, 0)),    # resident weight
                pl.BlockSpec((1, H), lambda i: (0, 0)),    # resident bias
            ],
            out_specs=pl.BlockSpec((tb, H), lambda i: (i, 0)),
        ),
        compiler_params=pltpu.CompilerParams(
            dimension_semantics=("parallel",),             # independent batch tiles
        ),
        cost_estimate=pl.CostEstimate(
            flops=2 * b_pad * F * H,
            transcendentals=0,
            bytes_accessed=4 * (b_pad * F + F * H + H + b_pad * H),
        ),
    )(x, w_t, b)

    return out[:B] if b_pad != B else out


if __name__ == "__main__":
    key = jax.random.PRNGKey(0)
    kx, kw, kb, kx2 = jax.random.split(key, 4)

    in_features = 32
    batch = 8

    x = jax.random.normal(kx, (batch, in_features), dtype=jnp.float32)
    # torch nn.Linear(in_features, hidden_dim): weight (out, in), bias (out,)
    weight = jax.random.normal(kw, (HIDDEN_DIM, in_features), dtype=jnp.float32) * 0.1
    bias = jax.random.normal(kb, (HIDDEN_DIM,), dtype=jnp.float32) * 0.1

    out = firstnet_forward(x, weight, bias)
    out = jax.block_until_ready(out)
    ref = jnp.maximum(x @ weight.T + bias, 0.0)
    assert out.shape == (batch, HIDDEN_DIM)
    assert jnp.allclose(out, ref, atol=1e-5, rtol=1e-5)

    # Exercise the tiled + padded path (batch not a multiple of the tile size).
    batch2 = 20
    x2 = jax.random.normal(kx2, (batch2, in_features), dtype=jnp.float32)
    out2 = jax.block_until_ready(firstnet_forward(x2, weight, bias, block_b=8))
    ref2 = jnp.maximum(x2 @ weight.T + bias, 0.0)
    assert out2.shape == (batch2, HIDDEN_DIM)
    assert jnp.allclose(out2, ref2, atol=1e-5, rtol=1e-5)

    print("KERNEL_OK")
</pallas_src>

<mosaic_0001>
module attributes {stable_mosaic.version = 11 : i64} {
  func.func @_firstnet_kernel(%arg0: i32, %arg1: memref<8x32xf32, #tpu.memory_space<vmem>>, %arg2: memref<32x16xf32, #tpu.memory_space<vmem>>, %arg3: memref<1x16xf32, #tpu.memory_space<vmem>>, %arg4: memref<8x16xf32, #tpu.memory_space<vmem>>) attributes {dimension_semantics = [#tpu.dimension_semantics<parallel>], iteration_bounds = array<i64: 1>, scalar_prefetch = 0 : i64, scratch_operands = 0 : i64, tpu.core_type = #tpu.core_type<tc>, window_params = [{transform_indices = @transform_0, window_bounds = array<i64: 8, 32>}, {pipeline_mode = #tpu.pipeline_mode<synchronous>, transform_indices = @transform_1, window_bounds = array<i64: 32, 16>}, {pipeline_mode = #tpu.pipeline_mode<synchronous>, transform_indices = @transform_2, window_bounds = array<i64: 1, 16>}, {transform_indices = @transform_3, window_bounds = array<i64: 8, 16>}]} {
    %c0 = arith.constant 0 : index
    %c0_0 = arith.constant 0 : index
    %0 = vector.load %arg1[%c0, %c0_0] : memref<8x32xf32, #tpu.memory_space<vmem>>, vector<8x32xf32>
    %c0_1 = arith.constant 0 : index
    %c0_2 = arith.constant 0 : index
    %1 = vector.load %arg2[%c0_1, %c0_2] : memref<32x16xf32, #tpu.memory_space<vmem>>, vector<32x16xf32>
    %cst = arith.constant dense<0.000000e+00> : vector<8x16xf32>
    %2 = tpu.matmul %0, %1, %cst {dimension_numbers = #tpu.dot_dimension_numbers<[1], [0], [0], [1], [0, 0, 1, 1], [], []>} : vector<8x32xf32>, vector<32x16xf32>, vector<8x16xf32> -> vector<8x16xf32>
    %c0_3 = arith.constant 0 : index
    %c0_4 = arith.constant 0 : index
    %3 = vector.load %arg3[%c0_3, %c0_4] : memref<1x16xf32, #tpu.memory_space<vmem>>, vector<1x16xf32>
    %4 = vector.broadcast %3 : vector<1x16xf32> to vector<8x16xf32>
    %5 = arith.addf %2, %4 : vector<8x16xf32>
    %cst_5 = arith.constant 0.000000e+00 : f32
    %6 = vector.broadcast %cst_5 : f32 to vector<8x16xf32>
    %7 = arith.maximumf %5, %6 : vector<8x16xf32>
    %c0_6 = arith.constant 0 : index
    %c0_7 = arith.constant 0 : index
    %8 = vector.load %arg4[%c0_6, %c0_7] : memref<8x16xf32, #tpu.memory_space<vmem>>, vector<8x16xf32>
    tpu.vector_store %arg4[%c0_6, %c0_7], %7 {strides = array<i32>} : memref<8x16xf32, #tpu.memory_space<vmem>>, vector<8x16xf32>,
    return
  }
  func.func @transform_0(%arg0: i32) -> (i32, i32) {
    %c0_i32 = arith.constant 0 : i32
    %c0_i32_0 = arith.constant 0 : i32
    return %arg0, %c0_i32 : i32, i32
  }
  func.func @transform_1(%arg0: i32) -> (i32, i32) {
    %c0_i32 = arith.constant 0 : i32
    %c0_i32_0 = arith.constant 0 : i32
    %c0_i32_1 = arith.constant 0 : i32
    return %c0_i32, %c0_i32_0 : i32, i32
  }
  func.func @transform_2(%arg0: i32) -> (i32, i32) {
    %c0_i32 = arith.constant 0 : i32
    %c0_i32_0 = arith.constant 0 : i32
    %c0_i32_1 = arith.constant 0 : i32
    return %c0_i32, %c0_i32_0 : i32, i32
  }
  func.func @transform_3(%arg0: i32) -> (i32, i32) {
    %c0_i32 = arith.constant 0 : i32
    %c0_i32_0 = arith.constant 0 : i32
    return %arg0, %c0_i32 : i32, i32
  }
}

</mosaic_0001>

<bundles_post_ra>
// kernel: tpu_custom_call.1
= control target key start
LH: loop header
LB: loop body
LE: loop exit
PB: predicated region body
PF: predicated region fallthrough
CT: control target
= control target key end

     0   :  { %v170_v3 = vmov 0.0|0.0   ;;  %vm171_vm0 = vmmov 0   ;;  %v172_v6 = vmov 0.0   ;;  %s224_s0 = inlined_call_operand.vmem [shape: f32[8,32], index: 0, kind: input, shape index: {}]   ;;  %s225_s1 = inlined_call_operand.vmem [shape: f32[32,16], index: 1, kind: input, shape index: {}]   ;;  %s226_s2 = inlined_call_operand.vmem [shape: f32[1,16], index: 2, kind: input, shape index: {}]   ;;  %s227_s3 = inlined_call_operand.hbm [shape: f32[8,16], index: 3, kind: output, shape index: {}]  }
   0x1   :  { %v16_v0 = vld [vmem:[%s225_s1] sm:$0xff]  ;;  %v17_v1 = vld [vmem:[%s225_s1 + $0x8] sm:$0xff]  ;;  %v18_v2 = vld [vmem:[%s225_s1 + $0x10] sm:$0xff]  ;;  %136 = vmatprep.subr.bf16.mxu0 %v170_v3  ;;  %133 = vmatprep.mubr.msk.f32.mxu0 %vm171_vm0, %v172_v6 }
   0x2   :  { %v137_v4 = vpack.c.bf16 %v17_v1, %v16_v0  ;;  %v19_v5 = vld [vmem:[%s225_s1 + $0x18] sm:$0xff] }
   0x3   :  { %8 = vsyncpa [#allocation3], 0  ;;  %v140_v7 = vpack.c.bf16 %v19_v5, %v18_v2  ;;  %v15_v8 = vld [vmem:[%s224_s0] sm:$0xff]  ;;  %vm27_vm1 = vcmask 261120   ;;  %s173_s1 = smov [#allocation2]   ;;  %vm102_vm2 = vcmask 130048  }
   0x4   :  { %138 = vmatpush3.bf16.msra.mxu0 %v137_v4  ;;  %v118_v9 = vld [vmem:[%s226_s2] ss:$0 sm:$0xff]  ;;  %s110_s24 = sshll.u32 %s173_s1, 4  ;;  %s111_s24 = int_to_ptr.vmem [resolvable:$true] %s110_s24 }
   0x5   :  { %139 = vmatprep.subr.bf16.mxu0 %v170_v3  ;;  %s146_s25 = scalar_lea.vmem %s111_s24, 128  ;;  %p151_p1 = scmp.lt.s32.totalorder %s111_s24, %s111_s24 }
   0x6   :  { %p147_p0 = scmp.ne.s32.totalorder %s111_s24, %s146_s25  ;;  %p152_p2 = scmp.lt.s32.totalorder %s146_s25, %s146_s25 }
   0x8   :  { %141 = vmatpush3.bf16.msra.mxu0 %v140_v7  ;;  %p153_p3 = por %p152_p2, %p151_p1 }
   0xa   :  { %p154_p4 = pnand %p153_p3, %p147_p0 }
   0xb   :  { %134 = vmatmul.mubr.msk.f32.vlgmr.msra.gmra.mrb[0].mxu0 %vm27_vm1, %v15_v8 }
  0xde   :  { %v97_v10 = vpop.f32.mrb[0].mxu0 }
  0xdf   :  { %v98_v11 = vadd.f32 %v118_v9, %v97_v10  ;;  %v135_v12 = vpop.f32.mrb[1].mxu0 }
  0xe1   :  { %v101_v13 = vmax.f32 %v98_v11, 0.0 }
  0xe3   :  { %103 = vst.msk [vmem:[#allocation2] sm:$0xff] %vm102_vm2, %v101_v13 }
  0xe4   :  { %157 = shalt.err (!%p154_p4)
}
  0xe5   :  { %s158_s2 = scalar_lea.hbm %s227_s3, 128 }
  0xe6   :  { %p159_p5 = scmp.ne.s32.totalorder %s227_s3, %s158_s2  ;;  %p162_p6 = scmp.lt.u32.totalorder %s158_s2, %s227_s3 }
  0xe8   :  { %p164_p7 = pnand %p162_p6, %p159_p5 }
  0xea   :  { %167 = shalt.err (!%p164_p7)
}
  0xeb   :  { %113 = dma.vmem_to_hbm [thread:$0]  %s111_s24, 128, %s227_s3, [#allocation3]  }
  0xec   :  { %168 = dma.done.wait [#allocation3], 128  }
  0xed   :  { %169 = vsyncadd [#allocation3], 4294967168 }
  0xee   :  { %117 = vsyncpa [#allocation3], 1 }

</bundles_post_ra>
